<compile_context>
chip_gen: v6e
topology: v6e:2x2x1
jax: 0.10.0
libtpu: 0.0.40
codegen_flags: <defaults>
</compile_context>

<pallas_src>
import jax
import jax.numpy as jnp
from jax import lax
from jax.experimental import pallas as pl
from jax.experimental.pallas import tpu as pltpu


def _round_up(x, m):
    return -(-x // m) * m


def _largest_divisor_tile(m, cap):
    """Largest multiple of 8 that divides m (m is a multiple of 8) and is <= cap."""
    t = min(m, max(8, (cap // 8) * 8))
    while m % t:
        t -= 8
    return t


def _gemm_bias_relu_kernel(a_ref, b_ref, bias_ref, o_ref):
    # a_ref:    (TM, Kp)  bf16 folded im2col patches
    # b_ref:    (Kp, TN)  bf16 folded weights (resident across M tiles)
    # bias_ref: (1,  TN)  f32
    # o_ref:    (TM, TN)  out dtype
    acc = jnp.dot(a_ref[...], b_ref[...], preferred_element_type=jnp.float32)
    acc = acc + bias_ref[...].astype(jnp.float32)            # broadcast (1, TN)
    o_ref[...] = jnp.maximum(acc, 0.0).astype(o_ref.dtype)   # fused ReLU


def basic_conv2d_nhwc(x_nhwc, weight_oihw, bias, *, stride=1, padding=0,
                      compute_dtype=jnp.bfloat16, out_dtype=None, tile_m=512):
    """Conv2d(stride, padding, dilation=1) + ReLU on an NHWC input."""
    N, H, W, Cin = x_nhwc.shape
    Cout, Cin_w, KH, KW = weight_oihw.shape
    assert Cin == Cin_w
    if out_dtype is None:
        out_dtype = compute_dtype

    Ho = (H + 2 * padding - KH) // stride + 1
    Wo = (W + 2 * padding - KW) // stride + 1
    K = KH * KW * Cin
    K_pad = _round_up(K, 128)

    # --- wrapper-side layout work (plain XLA) ------------------------------
    # Cast to the MXU compute dtype BEFORE materializing the im2col patches so
    # the big intermediate is written/read at 2 B/elem.
    x_pad = jnp.pad(x_nhwc.astype(compute_dtype),
                    ((0, 0), (padding, padding), (padding, padding), (0, 0)))

    # Fold the KH*KW taps into the contraction dim: concatenate the shifted
    # (and, for stride>1, pre-strided) windows along channels.  Concatenation
    # order (kh, kw, cin) matches the (KH, KW, Cin, Cout) -> (K, Cout) weight
    # reshape below.
    taps = []
    for kh in range(KH):
        for kw in range(KW):
            taps.append(x_pad[:,
                              kh:kh + stride * (Ho - 1) + 1:stride,
                              kw:kw + stride * (Wo - 1) + 1:stride, :])
    patches = jnp.concatenate(taps, axis=-1) if len(taps) > 1 else taps[0]
    lhs = patches.reshape(N * Ho * Wo, K)
    lhs = jnp.pad(lhs, ((0, 0), (0, K_pad - K)))              # lane-aligned K

    w_hwio = jnp.transpose(weight_oihw, (2, 3, 1, 0))         # (KH, KW, Cin, Cout)
    rhs = w_hwio.reshape(K, Cout).astype(compute_dtype)

    # Lane-dense Cout: pad to a multiple of 128.  If the whole folded weight
    # block is small (every GoogLeNet conv), keep it VMEM-resident by using a
    # single full-Cout tile -> rhs/bias DMA'd once for the whole kernel.
    Cout_pad = _round_up(Cout, 128)
    c_bytes = jnp.dtype(compute_dtype).itemsize
    o_bytes = jnp.dtype(out_dtype).itemsize
    rhs_bytes = K_pad * Cout_pad * c_bytes
    if rhs_bytes <= 2 * 1024 * 1024:
        tile_n = Cout_pad
    else:
        tile_n = 256 if Cout_pad % 256 == 0 else 128
    rhs = jnp.pad(rhs, ((0, K_pad - K), (0, Cout_pad - Cout)))
    bias_row = jnp.pad(bias.astype(jnp.float32).reshape(1, Cout),
                       ((0, 0), (0, Cout_pad - Cout)))

    # M tiling: pick a multiple of 8 that divides the (8-rounded) row count so
    # M_pad == M8 (no post-kernel copy), keep >= 2 M tiles for megacore, and
    # shrink if the double-buffered footprint would exceed the VMEM budget.
    M = N * Ho * Wo
    M8 = _round_up(M, 8)
    budget = 48 * 1024 * 1024          # sub-64 MiB: v7x headroom; fine on v5e/v6e
    cap = max(8, tile_m)
    while True:
        tm = _largest_divisor_tile(M8, cap)
        if M8 // tm < 2 and M8 >= 16:
            tm = _largest_divisor_tile(M8, max(8, tm // 2))
        need = 2 * (tm * K_pad * c_bytes + K_pad * tile_n * c_bytes
                    + tile_n * 4 + tm * tile_n * o_bytes)
        if need <= budget // 2 or tm <= 8:
            break
        cap = max(8, tm // 2)
    tile_m = tm
    M_pad = _round_up(M8, tile_m)      # == M8 by construction of tile_m
    # Padded rows (if any) compute ReLU(bias) — NOT zero — and are sliced off.
    lhs = jnp.pad(lhs, ((0, M_pad - M), (0, 0)))

    grid = (M_pad // tile_m, Cout_pad // tile_n)
    vmem_limit = int(min(max(int(need * 1.25), 16 * 1024 * 1024), budget))

    out = pl.pallas_call(
        _gemm_bias_relu_kernel,
        out_shape=jax.ShapeDtypeStruct((M_pad, Cout_pad), out_dtype),
        grid_spec=pltpu.PrefetchScalarGridSpec(
            num_scalar_prefetch=0,
            grid=grid,
            in_specs=[
                pl.BlockSpec((tile_m, K_pad), lambda i, j: (i, 0)),
                pl.BlockSpec((K_pad, tile_n), lambda i, j: (0, j)),
                pl.BlockSpec((1, tile_n), lambda i, j: (0, j)),
            ],
            out_specs=pl.BlockSpec((tile_m, tile_n), lambda i, j: (i, j)),
        ),
        compiler_params=pltpu.CompilerParams(
            dimension_semantics=("parallel", "parallel"),
            vmem_limit_bytes=vmem_limit),
    )(lhs, rhs, bias_row)

    if M_pad != M or Cout_pad != Cout:
        out = out[:M, :Cout]
    return out.reshape(N, Ho, Wo, Cout)


def basic_conv2d(x_nchw, weight_oihw, bias, *, stride=1, padding=0, **kwargs):
    """Torch-parity NCHW wrapper around the NHWC core.

    A full GoogLeNet should stay NHWC end-to-end (and keep bf16 activations +
    padded Cout) and call basic_conv2d_nhwc directly so these per-layer
    transposes / dtype round-trips disappear.
    """
    x_nhwc = jnp.transpose(x_nchw, (0, 2, 3, 1))
    out = basic_conv2d_nhwc(x_nhwc, weight_oihw, bias,
                            stride=stride, padding=padding, **kwargs)
    return jnp.transpose(out, (0, 3, 1, 2))


def _reference(x_nchw, weight_oihw, bias, *, stride=1, padding=0):
    out = lax.conv_general_dilated(
        x_nchw.astype(jnp.float32), weight_oihw.astype(jnp.float32),
        window_strides=(stride, stride),
        padding=[(padding, padding), (padding, padding)],
        dimension_numbers=("NCHW", "OIHW", "NCHW"))
    out = out + bias.astype(jnp.float32)[None, :, None, None]
    return jnp.maximum(out, 0.0)


if __name__ == "__main__":
    # BasicConv2d(in_channels=4, out_channels=8, kernel_size=3, padding=1)
    N, Cin, H, W = 2, 4, 16, 16
    Cout, KH, KW = 8, 3, 3
    stride, padding = 1, 1

    key = jax.random.PRNGKey(0)
    kx, kw_, kb = jax.random.split(key, 3)
    x = jax.random.normal(kx, (N, Cin, H, W), dtype=jnp.float32)
    weight = jax.random.normal(kw_, (Cout, Cin, KH, KW), dtype=jnp.float32) * 0.1
    bias = jax.random.normal(kb, (Cout,), dtype=jnp.float32) * 0.1

    # Default path: bf16 MXU inputs, bf16 output (what a full bf16 NHWC
    # GoogLeNet would consume).  Loose check vs. the fp32 reference.
    out_bf16 = basic_conv2d(x, weight, bias, stride=stride, padding=padding)
    out_bf16 = jax.block_until_ready(out_bf16)
    assert out_bf16.shape == (N, Cout, H, W), out_bf16.shape
    ref32 = _reference(x, weight, bias, stride=stride, padding=padding)
    assert jnp.allclose(out_bf16.astype(jnp.float32), ref32,
                        atol=3e-2, rtol=3e-2), \
        float(jnp.max(jnp.abs(out_bf16.astype(jnp.float32) - ref32)))

    # fp32-output path: tight check vs. a reference fed the same bf16-rounded
    # inputs (validates the fp32 accumulation + epilogue exactly).
    out_f32 = basic_conv2d(x, weight, bias, stride=stride, padding=padding,
                           out_dtype=jnp.float32)
    out_f32 = jax.block_until_ready(out_f32)
    ref_bf16 = _reference(
        x.astype(jnp.bfloat16).astype(jnp.float32),
        weight.astype(jnp.bfloat16).astype(jnp.float32),
        bias, stride=stride, padding=padding)
    assert jnp.allclose(out_f32, ref_bf16, atol=1e-4, rtol=1e-4), \
        float(jnp.max(jnp.abs(out_f32 - ref_bf16)))

    print("KERNEL_OK")
</pallas_src>

<mosaic_0001>
module attributes {stable_mosaic.version = 11 : i64} {
  func.func @_gemm_bias_relu_kernel(%arg0: i32, %arg1: i32, %arg2: memref<256x128xbf16, #tpu.memory_space<vmem>>, %arg3: memref<128x128xbf16, #tpu.memory_space<vmem>>, %arg4: memref<1x128xf32, #tpu.memory_space<vmem>>, %arg5: memref<256x128xbf16, #tpu.memory_space<vmem>>) attributes {dimension_semantics = [#tpu.dimension_semantics<parallel>, #tpu.dimension_semantics<parallel>], iteration_bounds = array<i64: 2, 1>, scalar_prefetch = 0 : i64, scratch_operands = 0 : i64, tpu.core_type = #tpu.core_type<tc>, window_params = [{transform_indices = @transform_0, window_bounds = array<i64: 256, 128>}, {transform_indices = @transform_1, window_bounds = array<i64: 128, 128>}, {transform_indices = @transform_2, window_bounds = array<i64: 1, 128>}, {transform_indices = @transform_3, window_bounds = array<i64: 256, 128>}]} {
    %c0 = arith.constant 0 : index
    %c0_0 = arith.constant 0 : index
    %0 = vector.load %arg2[%c0, %c0_0] : memref<256x128xbf16, #tpu.memory_space<vmem>>, vector<256x128xbf16>
    %c0_1 = arith.constant 0 : index
    %c0_2 = arith.constant 0 : index
    %1 = vector.load %arg3[%c0_1, %c0_2] : memref<128x128xbf16, #tpu.memory_space<vmem>>, vector<128x128xbf16>
    %cst = arith.constant dense<0.000000e+00> : vector<256x128xf32>
    %2 = tpu.matmul %0, %1, %cst {dimension_numbers = #tpu.dot_dimension_numbers<[1], [0], [0], [1], [0, 0, 1, 1], [], []>} : vector<256x128xbf16>, vector<128x128xbf16>, vector<256x128xf32> -> vector<256x128xf32>
    %c0_3 = arith.constant 0 : index
    %c0_4 = arith.constant 0 : index
    %3 = vector.load %arg4[%c0_3, %c0_4] : memref<1x128xf32, #tpu.memory_space<vmem>>, vector<1x128xf32>
    %4 = vector.broadcast %3 : vector<1x128xf32> to vector<256x128xf32>
    %5 = arith.addf %2, %4 : vector<256x128xf32>
    %cst_5 = arith.constant 0.000000e+00 : f32
    %6 = vector.broadcast %cst_5 : f32 to vector<256x128xf32>
    %7 = arith.maximumf %5, %6 : vector<256x128xf32>
    %8 = arith.truncf %7 : vector<256x128xf32> to vector<256x128xbf16>
    %c0_6 = arith.constant 0 : index
    %c0_7 = arith.constant 0 : index
    %9 = vector.load %arg5[%c0_6, %c0_7] : memref<256x128xbf16, #tpu.memory_space<vmem>>, vector<256x128xbf16>
    tpu.vector_store %arg5[%c0_6, %c0_7], %8 {strides = array<i32>} : memref<256x128xbf16, #tpu.memory_space<vmem>>, vector<256x128xbf16>,
    return
  }
  func.func @transform_0(%arg0: i32, %arg1: i32) -> (i32, i32) {
    %c0_i32 = arith.constant 0 : i32
    %c0_i32_0 = arith.constant 0 : i32
    return %arg0, %c0_i32 : i32, i32
  }
  func.func @transform_1(%arg0: i32, %arg1: i32) -> (i32, i32) {
    %c0_i32 = arith.constant 0 : i32
    %c0_i32_0 = arith.constant 0 : i32
    return %c0_i32, %arg1 : i32, i32
  }
  func.func @transform_2(%arg0: i32, %arg1: i32) -> (i32, i32) {
    %c0_i32 = arith.constant 0 : i32
    %c0_i32_0 = arith.constant 0 : i32
    return %c0_i32, %arg1 : i32, i32
  }
  func.func @transform_3(%arg0: i32, %arg1: i32) -> (i32, i32) {
    %c0_i32 = arith.constant 0 : i32
    return %arg0, %arg1 : i32, i32
  }
}

</mosaic_0001>

<bundles_post_ra>
// kernel: tpu_custom_call.1
= control target key start
LH: loop header
LB: loop body
LE: loop exit
PB: predicated region body
PF: predicated region fallthrough
CT: control target
= control target key end

     0   :  { %8 = vsyncpa [#allocation3], 0  ;;  %s1741_s0 = inlined_call_operand.hbm [shape: bf16[512,128], index: 0, kind: input, shape index: {}]   ;;  %s1742_s1 = inlined_call_operand.hbm [shape: bf16[128,128], index: 1, kind: input, shape index: {}]   ;;  %s1743_s2 = inlined_call_operand.vmem [shape: f32[1,128], index: 2, kind: input, shape index: {}]   ;;  %s1744_s3 = inlined_call_operand.hbm [shape: bf16[512,128], index: 3, kind: output, shape index: {}]  }
   0x1   :  { %10 = vsyncpa [#allocation3 + $0x1], 0 }
   0x2   :  { %11 = vsyncpa [#allocation6], 0 }
   0x3   :  { %12 = vsyncpa [#allocation4], 0 }
   0x4   :  { %14 = vsyncpa [#allocation4 + $0x1], 0  ;;  %s1476_s12 = smov 0   ;;  %s1478_s13 = smov 0  }
   0x5   :  { %s1480_s14 = smov 0   ;;  %s1482_s15 = smov 0  }
   0x6   :  { %s1484_s16 = smov 0   ;;  %s1486_s17 = smov 0  }
   0x7 LB: > { %s916_s18 = sadd.s32 4294967295, %s1447_s17   ;;  %s917_s19 = sadd.s32 4294967294, %s1447_s17   ;;  %s1447_s17 = sphi %s1486_s17, %s20_s17   ;;  %s1443_s16 = sphi %s1484_s16, %s1766_s16   ;;  %s1439_s15 = sphi %s1482_s15, %s1765_s15   ;;  %s1435_s14 = sphi %s1480_s14, %s1764_s14   ;;  %s1431_s13 = sphi %s1478_s13, %s1763_s13   ;;  %s1427_s12 = sphi %s1476_s12, %s1762_s12  }
   0x8   : > { %p52_p0 = scmp.ne.s32.totalorder %s1431_s13, %s1427_s12  ;;  %p1510_p1 = scmp.eq.s32.totalorder %s916_s18, 0 }
   0x9   : > { %p1514_p2 = scmp.eq.s32.totalorder %s916_s18, 1  ;;  %p136_p3 = scmp.eq.s32.totalorder %s917_s19, 1 }
   0xa   : > { %p1520_p4 = por %p1510_p1, %p52_p0  ;;  %p918_p5 = scmp.ge.s32.totalorder %s1447_s17, 1 }
   0xb   : > { %p1525_p6 = por %p136_p3, %p52_p0  ;;  %p143_p7 = scmp.lt.s32.totalorder %s1447_s17, 3 }
   0xc   : > { %s1750_s22 = scalar_select %p1520_p4, 1, 0 }
   0xd   : > { %s1751_s23 = scalar_select %p1525_p6, 1, 0 }
   0xe   : > { %p1530_p8 = pnand %p918_p5, %p143_p7  ;;  %s1449_s25 = smov [#allocation5]  }
   0xf   : > { %s157_s26 = sshll.u32 %s1449_s25, 4  ;;  %s32_s28 = sadd.s32 1, %s1443_s16  ;;  %s158_s26 = int_to_ptr.vmem [resolvable:$true] %s157_s26 }
  0x10   : > { %p1216_p9 = pneg %p1530_p8  ;;  %s1320_s29 = scalar_lea.vmem %s158_s26, 1024 }
  0x11   : > { %p1321_p13 = scmp.ne.s32.totalorder %s158_s26, %s1320_s29  ;;  %p1328_p5 = scmp.lt.s32.totalorder %s158_s26, %s158_s26 }
  0x12   : > { %p1539_p11 = pnand %p1216_p9, %p1510_p1  ;;  %p1329_p7 = scmp.lt.s32.totalorder %s1320_s29, %s1320_s29 }
  0x14   : > { %p1311_p12 = pneg %p1539_p11  ;;  %p1330_p6 = por %p1329_p7, %p1328_p5 }
  0x16   : > { %p1323_p0 = pnand %p1321_p13, %p1311_p12 }
  0x18   : > { %p1324_p3 = pneg %p1323_p0 }
  0x1a   : > { %p1331_p4 = pnand %p1330_p6, %p1324_p3 }
  0x1c   : > { %1334 = shalt.err (!%p1331_p4)
}
  0x1d   : > { %s1746_s30 = smov 64   ;;  %s1747_s4 = smov 4  }
  0x1e   : > { %1219 = dma.hbm_to_vmem [thread:$0]  (!%p1539_p11), %s1742_s1, 1024, %s158_s26, [#allocation6], %s1746_s30, %s1746_s30, %s1747_s4  }
  0x1f   : > { %p34_p4 = scmp.ge.s32.totalorder %s32_s28, 2  ;;  %s39_s7 = sadd.s32 1, %s1435_s14 }
  0x20   : > { %p46_p6 = scmp.ne.s32.totalorder %s1435_s14, %s1431_s13  ;;  %p47_p9 = scmp.eq.s32.totalorder %s1447_s17, 0 }
  0x21   : > { %s1768_s28 = smov (%p34_p4, %s32_s28), 0  ;;  %p1229_p0 = scmp.lt.s32.totalorder %s1447_s17, 2 }
  0x22   : > { %p1560_p12 = por %p47_p9, %p46_p6  ;;  %p1566_p13 = por %p1514_p2, %p46_p6 }
  0x23   : > { %s36_s10 = ssub.s32 %s1443_s16, %s1768_s28  ;;  %s177_s11 = sand.u32 1, %s1435_s14  }
  0x24   : > { %p37_p11 = scmp.eq.s32.totalorder %s36_s10, 0  ;;  %s922_s18 = sshll.u32 %s177_s11, 7 }
  0x25   : > { %s991_s25 = sshll.u32 %s1443_s16, 11  ;;  %s181_s5 = scalar_lea.vmem [#allocation2], %s922_s18 }
  0x26   : > { %s1575_s19 = scalar_select %p37_p11, %s1435_s14, %s39_s7  }
  0x27   : > { %s187_s29 = scalar_lea.hbm %s1741_s0, %s991_s25  ;;  %s188_s6 = sshll.u32 %s181_s5, 4  ;;  %s189_s6 = int_to_ptr.vmem [resolvable:$true] %s188_s6 }
  0x28   : > { %p1583_p2 = pnand %p1229_p0, %p1560_p12  ;;  %s178_s30 = scalar_lea.sflag [#allocation3], %s177_s11 }
  0x29   : > { %s1348_s10 = scalar_lea.vmem %s189_s6, 2048  ;;  %s1452_s7 = smov [#allocation2]  }
  0x2a   : > { %p1337_p3 = pneg %p1583_p2  ;;  %p1349_p5 = scmp.ne.s32.totalorder %s189_s6, %s1348_s10 }
  0x2b   : > { %s1353_s4 = sshll.u32 %s1452_s7, 4  ;;  %s1354_s4 = int_to_ptr.vmem [resolvable:$false] %s1353_s4 }
  0x2c   : > { %p1351_p7 = pnand %p1349_p5, %p1337_p3  ;;  %s1355_s25 = scalar_lea.vmem %s1354_s4, 4096 }
  0x2d   : > { %p1356_p6 = scmp.lt.s32.totalorder %s189_s6, %s1354_s4  ;;  %p1357_p9 = scmp.lt.s32.totalorder %s1355_s25, %s1348_s10 }
  0x2e   : > { %p1352_p4 = pneg %p1351_p7 }
  0x2f   : > { %p1358_p11 = por %p1357_p9, %p1356_p6 }
  0x31   : > { %p1359_p10 = pnand %p1358_p11, %p1352_p4 }
  0x33   : > { %1362 = shalt.err (!%p1359_p10)
}
  0x34   : > { %s1757_s8 = smov 4   ;;  %s1758_s18 = smov 64  }
  0x35   : > { %1223 = dma.hbm_to_vmem [thread:$0]  (!%p1583_p2), %s187_s29, 2048, %s189_s6, %s178_s30, %s1758_s18, %s1758_s18, %s1757_s8  }
  0x36   : > { %200 = sbr.rel (%p1530_p8) target bundleno = 338 (0x152), region = 32  ;;  %s1597_s11 = sand.u32 (!%p1530_p8), 1, %s1431_s13  }
  0x37   : > { %s926_s4 = sshll.u32 (!%p1530_p8), %s1597_s11, 7  ;;  %s203_s26 = scalar_lea.sflag (!%p1530_p8), [#allocation3], %s1597_s11 }
  0x38   : > { %s1603_s27 = scalar_lea.vmem (!%p1530_p8), [#allocation2], %s926_s4  ;;  %p1759_p10 = scmp.ne.s32.totalorder (!%p1530_p8), %s1750_s22, 0 }
  0x3b   : > { %1414 = dma.done.wait (%p1759_p10), %s203_s26, 2048  }
  0x3c   : > { %1416 = vsyncadd (%p1759_p10), %s203_s26, 4294965248 }
  0x3d   : > { %1418 = dma.done.wait (%p1510_p1), [#allocation6], 1024  }
  0x3e   : > { %1420 = vsyncadd (%p1510_p1), [#allocation6], 4294966272  ;;  %v1285_v0 = vld [vmem:[#allocation5 + $0x38] sm:$0xff]   ;;  %v1286_v1 = vld [vmem:[#allocation5 + $0x30] sm:$0xff]   ;;  %s1646_s24 = scalar_lea.vmem [#allocation7], %s926_s4  ;;  %s1024_s30 = sshll.u32 %s1439_s15, 11 }
  0x3f   : > { %1144 = vmatprep.subr.bf16.mxu0 %v1285_v0  ;;  %1192 = vmatprep.subr.bf16.mxu1 %v1285_v0  ;;  %v1287_v2 = vld [vmem:[#allocation5 + $0x28] sm:$0xff]   ;;  %v1288_v3 = vld [vmem:[#allocation5 + $0x20] sm:$0xff]   ;;  %v1289_v6 = vld [vmem:[#allocation5 + $0x18] sm:$0xff]   ;;  %s809_s29 = sshll.u32 %s1646_s24, 4  ;;  %s1687_s21 = scalar_lea.hbm %s1744_s3, %s1024_s30  ;;  %s1689_s29 = int_to_ptr.vmem [resolvable:$true] %s809_s29 }
  0x40   : > { %1145 = vmatpush3.bf16.msra.mxu0 %v1285_v0  ;;  %1200 = vmatpush3.bf16.msra.mxu1 %v1285_v0  ;;  %v1293_v4 = vld [vmem:[%s1603_s27] sm:$0xff]   ;;  %v1290_v7 = vld [vmem:[#allocation5 + $0x10] sm:$0xff]   ;;  %v1291_v8 = vld [vmem:[#allocation5 + $0x8] sm:$0xff]   ;;  %s795_s15 = scalar_lea.sflag [#allocation4], %s1597_s11  ;;  %s1363_s10 = scalar_lea.vmem %s1689_s29, 2048 }
  0x41   : > { %1146 = vmatprep.subr.bf16.mxu0 %v1286_v1  ;;  %1193 = vmatprep.subr.bf16.mxu1 %v1286_v1  ;;  %v1294_v5 = vld [vmem:[%s1603_s27 + $0x40] sm:$0xff]   ;;  %v1295_v10 = vld [vmem:[%s1603_s27 + $0x8] sm:$0xff]   ;;  %v1297_v12 = vld [vmem:[%s1603_s27 + $0x10] sm:$0xff]   ;;  %p1364_p1 = scmp.ne.s32.totalorder %s1689_s29, %s1363_s10  ;;  %s1453_s7 = smov [#allocation7]  }
  0x42   : > { %1160 = vmatprep.mubr.bf16.mxu0 %v1293_v4  ;;  %1176 = vmatprep.mubr.bf16.mxu1 %v1294_v5  ;;  %v1292_v9 = vld [vmem:[#allocation5] sm:$0xff]   ;;  %v1296_v11 = vld [vmem:[%s1603_s27 + $0x48] sm:$0xff]   ;;  %v1298_v13 = vld [vmem:[%s1603_s27 + $0x50] sm:$0xff]   ;;  %s1367_s25 = sshll.u32 %s1453_s7, 4  ;;  %s1368_s25 = int_to_ptr.vmem [resolvable:$false] %s1367_s25 }
  0x43   : > { %v1299_v14 = vld [vmem:[%s1603_s27 + $0x18] sm:$0xff]   ;;  %v1301_v16 = vld [vmem:[%s1603_s27 + $0x20] sm:$0xff]   ;;  %v1303_v18 = vld [vmem:[%s1603_s27 + $0x28] sm:$0xff]   ;;  %p1365_p8 = pnand %p1364_p1, %p1566_p13  ;;  %s1369_s8 = scalar_lea.vmem %s1368_s25, 4096 }
  0x44   : > { %1147 = vmatpush3.bf16.msra.mxu0 %v1286_v1  ;;  %1201 = vmatpush3.bf16.msra.mxu1 %v1286_v1  ;;  %v1300_v15 = vld [vmem:[%s1603_s27 + $0x58] sm:$0xff]   ;;  %v1302_v17 = vld [vmem:[%s1603_s27 + $0x60] sm:$0xff]   ;;  %v1304_v19 = vld [vmem:[%s1603_s27 + $0x68] sm:$0xff]   ;;  %p1370_p0 = scmp.lt.s32.totalorder %s1689_s29, %s1368_s25  ;;  %p1371_p2 = scmp.lt.s32.totalorder %s1369_s8, %s1363_s10 }
  0x45   : > { %1148 = vmatprep.subr.bf16.mxu0 %v1287_v2  ;;  %1194 = vmatprep.subr.bf16.mxu1 %v1287_v2  ;;  %v1305_v20 = vld [vmem:[%s1603_s27 + $0x30] sm:$0xff]   ;;  %v1307_v22 = vld [vmem:[%s1603_s27 + $0x38] sm:$0xff]   ;;  %v1632_v24 = vld [vmem:[%s1743_s2] ss:$0 sm:$0xff]  ;;  %p1366_p12 = pneg %p1365_p8 }
  0x46   : > { %v1306_v21 = vld [vmem:[%s1603_s27 + $0x70] sm:$0xff]   ;;  %v1308_v23 = vld [vmem:[%s1603_s27 + $0x78] sm:$0xff]   ;;  %p1372_p3 = por %p1371_p2, %p1370_p0 }
  0x48   : > { %1149 = vmatpush3.bf16.msra.mxu0 %v1287_v2  ;;  %1202 = vmatpush3.bf16.msra.mxu1 %v1287_v2  ;;  %p1373_p5 = pnand %p1372_p3, %p1366_p12 }
  0x49   : > { %1150 = vmatprep.subr.bf16.mxu0 %v1288_v3  ;;  %1195 = vmatprep.subr.bf16.mxu1 %v1288_v3 }
  0x4c   : > { %1151 = vmatpush3.bf16.msra.mxu0 %v1288_v3  ;;  %1203 = vmatpush3.bf16.msra.mxu1 %v1288_v3 }
  0x4d   : > { %1152 = vmatprep.subr.bf16.mxu0 %v1289_v6  ;;  %1196 = vmatprep.subr.bf16.mxu1 %v1289_v6 }
  0x50   : > { %1153 = vmatpush3.bf16.msra.mxu0 %v1289_v6  ;;  %1204 = vmatpush3.bf16.msra.mxu1 %v1289_v6 }
  0x51   : > { %1154 = vmatprep.subr.bf16.mxu0 %v1290_v7  ;;  %1197 = vmatprep.subr.bf16.mxu1 %v1290_v7 }
  0x54   : > { %1155 = vmatpush3.bf16.msra.mxu0 %v1290_v7  ;;  %1205 = vmatpush3.bf16.msra.mxu1 %v1290_v7 }
  0x55   : > { %1156 = vmatprep.subr.bf16.mxu0 %v1291_v8  ;;  %1198 = vmatprep.subr.bf16.mxu1 %v1291_v8 }
  0x58   : > { %1157 = vmatpush3.bf16.msra.mxu0 %v1291_v8  ;;  %1206 = vmatpush3.bf16.msra.mxu1 %v1291_v8 }
  0x59   : > { %1158 = vmatprep.subr.bf16.mxu0 %v1292_v9  ;;  %1199 = vmatprep.subr.bf16.mxu1 %v1292_v9 }
  0x5c   : > { %1159 = vmatpush3.bf16.msra.mxu0 %v1292_v9  ;;  %1207 = vmatpush3.bf16.msra.mxu1 %v1292_v9 }
  0x5f   : > { %1161 = vmatmul.mubr.bf16.vlgmr.msra.gmra.mxu0 %v1295_v10  ;;  %1177 = vmatmul.mubr.bf16.vlgmr.msra.gmra.mxu1 %v1296_v11 }
  0x60   : > { %1164 = vmatprep.mubr.bf16.mxu0 %v1297_v12  ;;  %1180 = vmatprep.mubr.bf16.mxu1 %v1298_v13 }
  0x67   : > { %1165 = vmatmul.mubr.bf16.gmra.mxu0 %v1299_v14  ;;  %1181 = vmatmul.mubr.bf16.gmra.mxu1 %v1300_v15 }
  0x68   : > { %1168 = vmatprep.mubr.bf16.mxu0 %v1301_v16  ;;  %1184 = vmatprep.mubr.bf16.mxu1 %v1302_v17 }
  0x6f   : > { %1169 = vmatmul.mubr.bf16.gmra.mxu0 %v1303_v18  ;;  %1185 = vmatmul.mubr.bf16.gmra.mxu1 %v1304_v19 }
  0x70   : > { %1172 = vmatprep.mubr.bf16.mxu0 %v1305_v20  ;;  %1188 = vmatprep.mubr.bf16.mxu1 %v1306_v21 }
  0x77   : > { %1173 = vmatmul.mubr.bf16.gmra.mxu0 %v1307_v22  ;;  %1189 = vmatmul.mubr.bf16.gmra.mxu1 %v1308_v23 }
 0x11f   : > { %v1162_v25 = vpop.f32.mrf.mxu0  ;;  %v1178_v26 = vpop.f32.mrf.mxu1 }
 0x120   : > { %v484_v27 = vadd.f32 %v1162_v25, %v1632_v24  ;;  %v548_v28 = vadd.f32 %v1178_v26, %v1632_v24 }
 0x121   : > { %v475_v29 = vpop.f32.mrf.mxu0  ;;  %v539_v30 = vpop.f32.mrf.mxu1 }
 0x122   : > { %v476_v31 = vadd.f32 %v1632_v24, %v475_v29  ;;  %v540_v32 = vadd.f32 %v1632_v24, %v539_v30  ;;  %v604_v37 = vmax.f32 %v484_v27, 0.0  ;;  %v620_v38 = vmax.f32 %v548_v28, 0.0 }
 0x123   : > { %v1163_v33 = vpop.f32.mrf.mxu0  ;;  %v1179_v34 = vpop.f32.mrf.mxu1 }
 0x124   : > { %v487_v35 = vadd.f32 %v1163_v33, %v1632_v24  ;;  %v551_v36 = vadd.f32 %v1179_v34, %v1632_v24  ;;  %v602_v45 = vmax.f32 %v476_v31, 0.0  ;;  %v618_v46 = vmax.f32 %v540_v32, 0.0 }
 0x125   : > { %v478_v39 = vpop.f32.mrf.mxu0  ;;  %v542_v40 = vpop.f32.mrf.mxu1 }
 0x126   : > { %v605_v41 = vmax.f32 %v487_v35, 0.0  ;;  %v621_v42 = vmax.f32 %v551_v36, 0.0  ;;  %v479_v43 = vadd.f32 %v1632_v24, %v478_v39  ;;  %v543_v44 = vadd.f32 %v1632_v24, %v542_v40 }
 0x127   : > { %v1166_v47 = vpop.f32.mrf.mxu0  ;;  %v1182_v48 = vpop.f32.mrf.mxu1 }
 0x128   : > { %v1033_v49 = vpack.c.bf16 %v605_v41, %v604_v37  ;;  %v1073_v50 = vpack.c.bf16 %v621_v42, %v620_v38  ;;  %v603_v51 = vmax.f32 %v479_v43, 0.0  ;;  %v619_v52 = vmax.f32 %v543_v44, 0.0 }
 0x129   : > { %v500_v53 = vadd.f32 %v1166_v47, %v1632_v24  ;;  %v564_v54 = vadd.f32 %v1182_v48, %v1632_v24  ;;  %v491_v55 = vpop.f32.mrf.mxu0  ;;  %v555_v56 = vpop.f32.mrf.mxu1 }
 0x12a   : > { %1105 = vst [vmem:[%s1646_s24 + $0x8] sm:$0xff] %v1033_v49   ;;  %1113 = vst [vmem:[%s1646_s24 + $0x48] sm:$0xff] %v1073_v50   ;;  %v1028_v57 = vpack.c.bf16 %v603_v51, %v602_v45  ;;  %v1068_v58 = vpack.c.bf16 %v619_v52, %v618_v46  ;;  %v492_v59 = vadd.f32 %v1632_v24, %v491_v55 }
 0x12b   : > { %v556_v60 = vadd.f32 %v1632_v24, %v555_v56  ;;  %v1167_v61 = vpop.f32.mrf.mxu0  ;;  %v1183_v62 = vpop.f32.mrf.mxu1  ;;  %v608_v1 = vmax.f32 %v500_v53, 0.0  ;;  %v624_v2 = vmax.f32 %v564_v54, 0.0 }
 0x12c   : > { %1029 = vst [vmem:[%s1646_s24] sm:$0xff] %v1028_v57   ;;  %1112 = vst [vmem:[%s1646_s24 + $0x40] sm:$0xff] %v1068_v58   ;;  %v503_v63 = vadd.f32 %v1167_v61, %v1632_v24  ;;  %v567_v0 = vadd.f32 %v1183_v62, %v1632_v24  ;;  %v606_v9 = vmax.f32 %v492_v59, 0.0 }
 0x12d   : > { %v494_v3 = vpop.f32.mrf.mxu0  ;;  %v558_v4 = vpop.f32.mrf.mxu1  ;;  %v622_v10 = vmax.f32 %v556_v60, 0.0 }
 0x12e   : > { %v609_v5 = vmax.f32 %v503_v63, 0.0  ;;  %v625_v6 = vmax.f32 %v567_v0, 0.0  ;;  %v495_v7 = vadd.f32 %v1632_v24, %v494_v3  ;;  %v559_v8 = vadd.f32 %v1632_v24, %v558_v4 }
 0x12f   : > { %v1170_v11 = vpop.f32.mrf.mxu0  ;;  %v1186_v12 = vpop.f32.mrf.mxu1 }
 0x130   : > { %v1043_v13 = vpack.c.bf16 %v609_v5, %v608_v1  ;;  %v1083_v14 = vpack.c.bf16 %v625_v6, %v624_v2  ;;  %v607_v15 = vmax.f32 %v495_v7, 0.0  ;;  %v623_v16 = vmax.f32 %v559_v8, 0.0 }
 0x131   : > { %v516_v17 = vadd.f32 %v1170_v11, %v1632_v24  ;;  %v580_v18 = vadd.f32 %v1186_v12, %v1632_v24  ;;  %v507_v19 = vpop.f32.mrf.mxu0  ;;  %v571_v20 = vpop.f32.mrf.mxu1 }
 0x132   : > { %1107 = vst [vmem:[%s1646_s24 + $0x18] sm:$0xff] %v1043_v13   ;;  %1115 = vst [vmem:[%s1646_s24 + $0x58] sm:$0xff] %v1083_v14   ;;  %v1038_v21 = vpack.c.bf16 %v607_v15, %v606_v9  ;;  %v1078_v22 = vpack.c.bf16 %v623_v16, %v622_v10  ;;  %v508_v23 = vadd.f32 %v1632_v24, %v507_v19 }
 0x133   : > { %v572_v25 = vadd.f32 %v1632_v24, %v571_v20  ;;  %v1171_v26 = vpop.f32.mrf.mxu0  ;;  %v1187_v27 = vpop.f32.mrf.mxu1  ;;  %v612_v30 = vmax.f32 %v516_v17, 0.0  ;;  %v628_v31 = vmax.f32 %v580_v18, 0.0 }
 0x134   : > { %1106 = vst [vmem:[%s1646_s24 + $0x10] sm:$0xff] %v1038_v21   ;;  %1114 = vst [vmem:[%s1646_s24 + $0x50] sm:$0xff] %v1078_v22   ;;  %v519_v28 = vadd.f32 %v1171_v26, %v1632_v24  ;;  %v583_v29 = vadd.f32 %v1187_v27, %v1632_v24  ;;  %v610_v38 = vmax.f32 %v508_v23, 0.0 }
 0x135   : > { %v510_v32 = vpop.f32.mrf.mxu0  ;;  %v574_v33 = vpop.f32.mrf.mxu1  ;;  %v626_v39 = vmax.f32 %v572_v25, 0.0 }
 0x136   : > { %v613_v34 = vmax.f32 %v519_v28, 0.0  ;;  %v629_v35 = vmax.f32 %v583_v29, 0.0  ;;  %v511_v36 = vadd.f32 %v1632_v24, %v510_v32  ;;  %v575_v37 = vadd.f32 %v1632_v24, %v574_v33 }
 0x137   : > { %v1174_v40 = vpop.f32.mrf.mxu0  ;;  %v1190_v41 = vpop.f32.mrf.mxu1 }
 0x138   : > { %v1053_v42 = vpack.c.bf16 %v613_v34, %v612_v30  ;;  %v1093_v43 = vpack.c.bf16 %v629_v35, %v628_v31  ;;  %v611_v44 = vmax.f32 %v511_v36, 0.0  ;;  %v627_v45 = vmax.f32 %v575_v37, 0.0 }
 0x139   : > { %v532_v46 = vadd.f32 %v1174_v40, %v1632_v24  ;;  %v596_v47 = vadd.f32 %v1190_v41, %v1632_v24  ;;  %v523_v48 = vpop.f32.mrf.mxu0  ;;  %v587_v49 = vpop.f32.mrf.mxu1 }
 0x13a   : > { %1109 = vst [vmem:[%s1646_s24 + $0x28] sm:$0xff] %v1053_v42   ;;  %1117 = vst [vmem:[%s1646_s24 + $0x68] sm:$0xff] %v1093_v43   ;;  %v1048_v50 = vpack.c.bf16 %v611_v44, %v610_v38  ;;  %v1088_v51 = vpack.c.bf16 %v627_v45, %v626_v39  ;;  %v524_v52 = vadd.f32 %v1632_v24, %v523_v48 }
 0x13b   : > { %v588_v53 = vadd.f32 %v1632_v24, %v587_v49  ;;  %v1175_v54 = vpop.f32.mrf.mxu0  ;;  %v1191_v55 = vpop.f32.mrf.mxu1  ;;  %v616_v58 = vmax.f32 %v532_v46, 0.0  ;;  %v632_v59 = vmax.f32 %v596_v47, 0.0 }
 0x13c   : > { %1108 = vst [vmem:[%s1646_s24 + $0x20] sm:$0xff] %v1048_v50   ;;  %1116 = vst [vmem:[%s1646_s24 + $0x60] sm:$0xff] %v1088_v51   ;;  %v535_v56 = vadd.f32 %v1175_v54, %v1632_v24  ;;  %v599_v57 = vadd.f32 %v1191_v55, %v1632_v24  ;;  %v614_v2 = vmax.f32 %v524_v52, 0.0 }
 0x13d   : > { %v526_v60 = vpop.f32.mrf.mxu0  ;;  %v590_v61 = vpop.f32.mrf.mxu1  ;;  %v630_v3 = vmax.f32 %v588_v53, 0.0 }
 0x13e   : > { %v617_v62 = vmax.f32 %v535_v56, 0.0  ;;  %v633_v63 = vmax.f32 %v599_v57, 0.0  ;;  %v527_v0 = vadd.f32 %v1632_v24, %v526_v60  ;;  %v591_v1 = vadd.f32 %v1632_v24, %v590_v61 }
 0x140   : > { %v1063_v4 = vpack.c.bf16 %v617_v62, %v616_v58  ;;  %v1103_v5 = vpack.c.bf16 %v633_v63, %v632_v59  ;;  %v615_v6 = vmax.f32 %v527_v0, 0.0  ;;  %v631_v7 = vmax.f32 %v591_v1, 0.0 }
 0x142   : > { %1111 = vst [vmem:[%s1646_s24 + $0x38] sm:$0xff] %v1063_v4   ;;  %1119 = vst [vmem:[%s1646_s24 + $0x78] sm:$0xff] %v1103_v5   ;;  %v1058_v24 = vpack.c.bf16 %v615_v6, %v614_v2  ;;  %v1098_v8 = vpack.c.bf16 %v631_v7, %v630_v3 }
 0x144   : > { %1110 = vst [vmem:[%s1646_s24 + $0x30] sm:$0xff] %v1058_v24   ;;  %1118 = vst [vmem:[%s1646_s24 + $0x70] sm:$0xff] %v1098_v8  }
 0x145   : > { %1376 = shalt.err (!%p1373_p5)
}
 0x146   : > { %s1377_s18 = scalar_lea.hbm %s1687_s21, 2048  ;;  %s1381_s27 = scalar_lea.hbm %s1744_s3, 4096 }
 0x147   : > { %p1378_p7 = scmp.ne.s32.totalorder %s1687_s21, %s1377_s18  ;;  %p1382_p9 = scmp.lt.s32.totalorder %s1687_s21, %s1744_s3 }
 0x148   : > { %p1383_p11 = scmp.lt.s32.totalorder %s1381_s27, %s1377_s18 }
 0x149   : > { %p1379_p4 = pnand %p1378_p7, %p1566_p13 }
 0x14a   : > { %p1384_p10 = por %p1383_p11, %p1382_p9 }
 0x14b   : > { %p1380_p6 = pneg %p1379_p4 }
 0x14d   : > { %p1385_p1 = pnand %p1384_p10, %p1380_p6 }
 0x14f   : > { %1388 = shalt.err (!%p1385_p1)
}
 0x150   : > { %s1454_s24 = smov 64   ;;  %s1455_s30 = smov 4  }
 0x151   : > { %1214 = dma.vmem_to_hbm [thread:$0]  (%p1566_p13), %s1689_s29, 2048, %s1687_s21, %s795_s15, %s1454_s24, %s1454_s24, %s1455_s30  }
 0x152 PF: > { %s824_s5 = sand.u32 1, %s1427_s12   ;;  %p1760_p8 = scmp.ne.s32.totalorder %s1751_s23, 0 }
 0x153   : > { %p1761_p12 = scmp.ge.s32.totalorder %s1447_s17, 2  ;;  %s825_s6 = scalar_lea.sflag [#allocation4], %s824_s5 }
 0x155   : > { %p1225_p0 = pnand %p1761_p12, %p1760_p8 }
 0x157   : > { %p1226_p2 = pneg %p1225_p0 }
 0x159   : > { %1422 = dma.done.wait (%p1226_p2), %s825_s6, 2048  }
 0x15a   : > { %1424 = vsyncadd (%p1226_p2), %s825_s6, 4294965248  ;;  %s20_s17 = sadd.s32 1, %s1447_s17   ;;  %s1762_s12 = smov %s1431_s13 }
 0x15b   : > { %p17_p3 = scmp.ge.s32.totalorder %s20_s17, 4   ;;  %s1763_s13 = smov %s1435_s14 }
 0x15c   : > { %s1764_s14 = smov %s1575_s19  ;;  %s1765_s15 = smov %s1443_s16 }
 0x15d   : > { %s1766_s16 = smov %s1768_s28  ;;  %19 = sbr.rel (!%p17_p3) target bundleno = 7 (0x7), region = 85 }
 0x162   :  { %830 = vsyncpa [#allocation3], 1 }
 0x163   :  { %832 = vsyncpa [#allocation3 + $0x1], 1 }
 0x164   :  { %833 = vsyncpa [#allocation6], 1 }
 0x165   :  { %834 = vsyncpa [#allocation4], 1 }
 0x166   :  { %836 = vsyncpa [#allocation4 + $0x1], 1 }

</bundles_post_ra>
